<compile_context>
chip_gen: v7x
topology: tpu7x:2x2x1
jax: 0.10.0
libtpu: 0.0.40
codegen_flags: <defaults>
</compile_context>

<pallas_src>
import jax
import jax.numpy as jnp
from jax.experimental import pallas as pl
from jax.experimental.pallas import tpu as pltpu


def _round_up(n, m):
    return ((n + m - 1) // m) * m


def _critic_kernel(x_ref, u_ref,
                   w1x_ref, w1u_ref, b1_ref,
                   w2_ref, b2_ref,
                   w3_ref, b3_ref,
                   q_ref):
    """Fused twin-Q MLP on one batch tile. q_ref[:, 0] = q1, q_ref[:, 1] = q2."""
    dot_dtype = w1x_ref.dtype
    x = x_ref[...].astype(dot_dtype)
    u = u_ref[...].astype(dot_dtype)

    # Layer 1 (both heads fused along the output axis; concat-free on the input).
    h1 = (jnp.dot(x, w1x_ref[...], preferred_element_type=jnp.float32)
          + jnp.dot(u, w1u_ref[...], preferred_element_type=jnp.float32)
          + b1_ref[...])
    h1 = jnp.maximum(h1, 0.0)                                    # ReLU (f32)

    # Layer 2 (block-diagonal weight keeps the two heads independent).
    h2 = jnp.dot(h1.astype(dot_dtype), w2_ref[...],
                 preferred_element_type=jnp.float32) + b2_ref[...]
    h2 = jnp.maximum(h2, 0.0)                                    # ReLU (f32)

    # Layer 3 -> (tile_b, 2): column 0 is q1, column 1 is q2.
    q = jnp.dot(h2.astype(dot_dtype), w3_ref[...],
                preferred_element_type=jnp.float32) + b3_ref[...]
    q_ref[...] = q.astype(q_ref.dtype)


def critic_forward(x, u, packed_params, *, tile_b=512):
    """packed_params = (w1x, w1u, b1, w2, b2, w3, b3) from pack_critic_params."""
    w1x, w1u, b1, w2, b2, w3, b3 = packed_params
    B, obs_dim = x.shape
    action_dim = u.shape[1]
    H1 = w1x.shape[1]
    H2 = w2.shape[1]

    # Batch tile: multiple of 8 (f32 sublane), capped at the (padded) batch size.
    tile_b = _round_up(min(int(tile_b), _round_up(B, 8)), 8)
    Bp = _round_up(B, tile_b)
    if Bp != B:
        pad = Bp - B
        x = jnp.pad(x, ((0, pad), (0, 0)))
        u = jnp.pad(u, ((0, pad), (0, 0)))

    grid = (Bp // tile_b,)

    def batch_map(i):
        return (i, 0)

    def const_map(i):
        return (0, 0)

    in_specs = [
        pl.BlockSpec((tile_b, obs_dim), batch_map),
        pl.BlockSpec((tile_b, action_dim), batch_map),
        pl.BlockSpec(w1x.shape, const_map),
        pl.BlockSpec(w1u.shape, const_map),
        pl.BlockSpec(b1.shape, const_map),
        pl.BlockSpec(w2.shape, const_map),
        pl.BlockSpec(b2.shape, const_map),
        pl.BlockSpec(w3.shape, const_map),
        pl.BlockSpec(b3.shape, const_map),
    ]
    out_specs = pl.BlockSpec((tile_b, 2), batch_map)
    out_shape = jax.ShapeDtypeStruct((Bp, 2), jnp.float32)

    D = obs_dim + action_dim
    flops = 2 * Bp * (D * H1 + H1 * H2 + H2 * 2)
    param_bytes = sum(int(p.size) * p.dtype.itemsize for p in packed_params)
    bytes_accessed = 4 * Bp * (D + 2) + param_bytes

    q = pl.pallas_call(
        _critic_kernel,
        out_shape=out_shape,
        grid=grid,
        in_specs=in_specs,
        out_specs=out_specs,
        compiler_params=pltpu.CompilerParams(
            dimension_semantics=("parallel",)),
        cost_estimate=pl.CostEstimate(
            flops=flops, transcendentals=0, bytes_accessed=bytes_accessed),
    )(x, u, w1x, w1u, b1, w2, b2, w3, b3)

    return q[:B, 0:1], q[:B, 1:2]


# ----------------------------- parameter handling -----------------------------

def _init_linear(key, fan_in, fan_out):
    """PyTorch nn.Linear default init: U(-1/sqrt(fan_in), 1/sqrt(fan_in)).
    Weight returned as (in, out) [transposed vs torch's (out, in)]."""
    kw, kb = jax.random.split(key)
    bound = 1.0 / jnp.sqrt(jnp.float32(fan_in))
    w = jax.random.uniform(kw, (fan_in, fan_out), jnp.float32, -bound, bound)
    b = jax.random.uniform(kb, (1, fan_out), jnp.float32, -bound, bound)
    return w, b


def init_critic_params(key, obs_dim, action_dim, hidden_sizes, extra_dim=0):
    """Per-head parameters in torch-equivalent layout (weights transposed to (in, out))."""
    d_in = obs_dim + action_dim + extra_dim
    h1, h2 = hidden_sizes
    keys = jax.random.split(key, 6)
    w1a, b1a = _init_linear(keys[0], d_in, h1)
    w2a, b2a = _init_linear(keys[1], h1, h2)
    w3a, b3a = _init_linear(keys[2], h2, 1)
    w1b, b1b = _init_linear(keys[3], d_in, h1)
    w2b, b2b = _init_linear(keys[4], h1, h2)
    w3b, b3b = _init_linear(keys[5], h2, 1)
    return (w1a, b1a, w2a, b2a, w3a, b3a,
            w1b, b1b, w2b, b2b, w3b, b3b)


def _block_diag(a, b):
    ra, ca = a.shape
    rb, cb = b.shape
    out = jnp.zeros((ra + rb, ca + cb), a.dtype)
    out = out.at[:ra, :ca].set(a)
    out = out.at[ra:, ca:].set(b)
    return out


def pack_critic_params(per_head_params, obs_dim, dot_dtype=jnp.float32):
    """Fuse the two heads into shared lane-dense weights (done once, not per-forward).

    Returns (w1x, w1u, b1, w2, b2, w3, b3). Weights are cast to `dot_dtype`
    (e.g. bf16 for higher MXU throughput); biases stay f32 (added post-accumulation).
    """
    (w1a, b1a, w2a, b2a, w3a, b3a,
     w1b, b1b, w2b, b2b, w3b, b3b) = per_head_params

    w1 = jnp.concatenate([w1a, w1b], axis=1)           # (D+A, 2*h1)
    w1x = w1[:obs_dim].astype(dot_dtype)               # (D,   2*h1)
    w1u = w1[obs_dim:].astype(dot_dtype)               # (A,   2*h1)
    b1 = jnp.concatenate([b1a, b1b], axis=1)           # (1,   2*h1)

    w2 = _block_diag(w2a, w2b).astype(dot_dtype)       # (2*h1, 2*h2)
    b2 = jnp.concatenate([b2a, b2b], axis=1)           # (1,    2*h2)

    w3 = _block_diag(w3a, w3b).astype(dot_dtype)       # (2*h2, 2)
    b3 = jnp.concatenate([b3a, b3b], axis=1)           # (1,    2)

    return (w1x, w1u, b1, w2, b2, w3, b3)


def _reference_forward(x, u, per_head_params):
    """Pure-JAX reference of the original torch math (per-head, unfused)."""
    (w1a, b1a, w2a, b2a, w3a, b3a,
     w1b, b1b, w2b, b2b, w3b, b3b) = per_head_params
    xu = jnp.concatenate([x, u], axis=1)

    def head(w1, b1, w2, b2, w3, b3):
        h1 = jax.nn.relu(xu @ w1 + b1)
        h2 = jax.nn.relu(h1 @ w2 + b2)
        return h2 @ w3 + b3

    return (head(w1a, b1a, w2a, b2a, w3a, b3a),
            head(w1b, b1b, w2b, b2b, w3b, b3b))


if __name__ == "__main__":
    key = jax.random.PRNGKey(0)
    k_param, k_x, k_u = jax.random.split(key, 3)

    # Small, forward-consistent shapes.
    B = 8
    obs_dim = 16          # input_dim[0]
    action_dim = 4        # from get_action_info(action_space)
    hidden_sizes = (64, 32)

    raw_params = init_critic_params(k_param, obs_dim, action_dim, hidden_sizes)
    x = jax.random.normal(k_x, (B, obs_dim), jnp.float32)
    u = jax.random.normal(k_u, (B, action_dim), jnp.float32)

    r1, r2 = _reference_forward(x, u, raw_params)

    # 1) f32 MXU path: matches the original module's numerics.
    packed_f32 = pack_critic_params(raw_params, obs_dim, dot_dtype=jnp.float32)
    q1, q2 = jax.block_until_ready(critic_forward(x, u, packed_f32))
    assert q1.shape == (B, 1) and q2.shape == (B, 1)
    assert jnp.allclose(q1, r1, atol=1e-4, rtol=1e-4)
    assert jnp.allclose(q2, r2, atol=1e-4, rtol=1e-4)

    # 2) Exercise the batch-tiled grid + padding path (B=20 with tile_b=8 -> 3 tiles).
    k_x2, k_u2 = jax.random.split(jax.random.PRNGKey(1))
    B2 = 20
    x2 = jax.random.normal(k_x2, (B2, obs_dim), jnp.float32)
    u2 = jax.random.normal(k_u2, (B2, action_dim), jnp.float32)
    q1g, q2g = jax.block_until_ready(critic_forward(x2, u2, packed_f32, tile_b=8))
    r1g, r2g = _reference_forward(x2, u2, raw_params)
    assert q1g.shape == (B2, 1) and q2g.shape == (B2, 1)
    assert jnp.allclose(q1g, r1g, atol=1e-4, rtol=1e-4)
    assert jnp.allclose(q2g, r2g, atol=1e-4, rtol=1e-4)

    # 3) bf16 MXU-input path (f32 accumulation / f32 elementwise); looser numerics.
    packed_bf16 = pack_critic_params(raw_params, obs_dim, dot_dtype=jnp.bfloat16)
    q1b, q2b = jax.block_until_ready(critic_forward(x, u, packed_bf16))
    assert jnp.allclose(q1b, r1, atol=5e-2, rtol=5e-2)
    assert jnp.allclose(q2b, r2, atol=5e-2, rtol=5e-2)

    print("KERNEL_OK")
</pallas_src>

<mosaic_0001>
module attributes {stable_mosaic.version = 11 : i64} {
  func.func @_critic_kernel(%arg0: i32, %arg1: memref<8x16xf32, #tpu.memory_space<vmem>>, %arg2: memref<8x4xf32, #tpu.memory_space<vmem>>, %arg3: memref<16x128xf32, #tpu.memory_space<vmem>>, %arg4: memref<4x128xf32, #tpu.memory_space<vmem>>, %arg5: memref<1x128xf32, #tpu.memory_space<vmem>>, %arg6: memref<128x64xf32, #tpu.memory_space<vmem>>, %arg7: memref<1x64xf32, #tpu.memory_space<vmem>>, %arg8: memref<64x2xf32, #tpu.memory_space<vmem>>, %arg9: memref<1x2xf32, #tpu.memory_space<vmem>>, %arg10: memref<8x2xf32, #tpu.memory_space<vmem>>) attributes {dimension_semantics = [#tpu.dimension_semantics<parallel>], iteration_bounds = array<i64: 1>, scalar_prefetch = 0 : i64, scratch_operands = 0 : i64, tpu.core_type = #tpu.core_type<tc>, window_params = [{transform_indices = @transform_0, window_bounds = array<i64: 8, 16>}, {transform_indices = @transform_1, window_bounds = array<i64: 8, 4>}, {pipeline_mode = #tpu.pipeline_mode<synchronous>, transform_indices = @transform_2, window_bounds = array<i64: 16, 128>}, {pipeline_mode = #tpu.pipeline_mode<synchronous>, transform_indices = @transform_3, window_bounds = array<i64: 4, 128>}, {pipeline_mode = #tpu.pipeline_mode<synchronous>, transform_indices = @transform_4, window_bounds = array<i64: 1, 128>}, {pipeline_mode = #tpu.pipeline_mode<synchronous>, transform_indices = @transform_5, window_bounds = array<i64: 128, 64>}, {pipeline_mode = #tpu.pipeline_mode<synchronous>, transform_indices = @transform_6, window_bounds = array<i64: 1, 64>}, {pipeline_mode = #tpu.pipeline_mode<synchronous>, transform_indices = @transform_7, window_bounds = array<i64: 64, 2>}, {pipeline_mode = #tpu.pipeline_mode<synchronous>, transform_indices = @transform_8, window_bounds = array<i64: 1, 2>}, {transform_indices = @transform_9, window_bounds = array<i64: 8, 2>}]} {
    %c0 = arith.constant 0 : index
    %c0_0 = arith.constant 0 : index
    %0 = vector.load %arg1[%c0, %c0_0] : memref<8x16xf32, #tpu.memory_space<vmem>>, vector<8x16xf32>
    %c0_1 = arith.constant 0 : index
    %c0_2 = arith.constant 0 : index
    %1 = vector.load %arg2[%c0_1, %c0_2] : memref<8x4xf32, #tpu.memory_space<vmem>>, vector<8x4xf32>
    %c0_3 = arith.constant 0 : index
    %c0_4 = arith.constant 0 : index
    %2 = vector.load %arg3[%c0_3, %c0_4] : memref<16x128xf32, #tpu.memory_space<vmem>>, vector<16x128xf32>
    %cst = arith.constant dense<0.000000e+00> : vector<8x128xf32>
    %3 = tpu.matmul %0, %2, %cst {dimension_numbers = #tpu.dot_dimension_numbers<[1], [0], [0], [1], [0, 0, 1, 1], [], []>} : vector<8x16xf32>, vector<16x128xf32>, vector<8x128xf32> -> vector<8x128xf32>
    %c0_5 = arith.constant 0 : index
    %c0_6 = arith.constant 0 : index
    %4 = vector.load %arg4[%c0_5, %c0_6] : memref<4x128xf32, #tpu.memory_space<vmem>>, vector<4x128xf32>
    %cst_7 = arith.constant dense<0.000000e+00> : vector<8x128xf32>
    %5 = tpu.matmul %1, %4, %cst_7 {dimension_numbers = #tpu.dot_dimension_numbers<[1], [0], [0], [1], [0, 0, 1, 1], [], []>} : vector<8x4xf32>, vector<4x128xf32>, vector<8x128xf32> -> vector<8x128xf32>
    %6 = arith.addf %3, %5 : vector<8x128xf32>
    %c0_8 = arith.constant 0 : index
    %c0_9 = arith.constant 0 : index
    %7 = vector.load %arg5[%c0_8, %c0_9] : memref<1x128xf32, #tpu.memory_space<vmem>>, vector<1x128xf32>
    %8 = vector.broadcast %7 : vector<1x128xf32> to vector<8x128xf32>
    %9 = arith.addf %6, %8 : vector<8x128xf32>
    %cst_10 = arith.constant 0.000000e+00 : f32
    %10 = vector.broadcast %cst_10 : f32 to vector<8x128xf32>
    %11 = arith.maximumf %9, %10 : vector<8x128xf32>
    %c0_11 = arith.constant 0 : index
    %c0_12 = arith.constant 0 : index
    %12 = vector.load %arg6[%c0_11, %c0_12] : memref<128x64xf32, #tpu.memory_space<vmem>>, vector<128x64xf32>
    %cst_13 = arith.constant dense<0.000000e+00> : vector<8x64xf32>
    %13 = tpu.matmul %11, %12, %cst_13 {dimension_numbers = #tpu.dot_dimension_numbers<[1], [0], [0], [1], [0, 0, 1, 1], [], []>} : vector<8x128xf32>, vector<128x64xf32>, vector<8x64xf32> -> vector<8x64xf32>
    %c0_14 = arith.constant 0 : index
    %c0_15 = arith.constant 0 : index
    %14 = vector.load %arg7[%c0_14, %c0_15] : memref<1x64xf32, #tpu.memory_space<vmem>>, vector<1x64xf32>
    %15 = vector.broadcast %14 : vector<1x64xf32> to vector<8x64xf32>
    %16 = arith.addf %13, %15 : vector<8x64xf32>
    %cst_16 = arith.constant 0.000000e+00 : f32
    %17 = vector.broadcast %cst_16 : f32 to vector<8x64xf32>
    %18 = arith.maximumf %16, %17 : vector<8x64xf32>
    %c0_17 = arith.constant 0 : index
    %c0_18 = arith.constant 0 : index
    %19 = vector.load %arg8[%c0_17, %c0_18] : memref<64x2xf32, #tpu.memory_space<vmem>>, vector<64x2xf32>
    %cst_19 = arith.constant dense<0.000000e+00> : vector<8x2xf32>
    %20 = tpu.matmul %18, %19, %cst_19 {dimension_numbers = #tpu.dot_dimension_numbers<[1], [0], [0], [1], [0, 0, 1, 1], [], []>} : vector<8x64xf32>, vector<64x2xf32>, vector<8x2xf32> -> vector<8x2xf32>
    %c0_20 = arith.constant 0 : index
    %c0_21 = arith.constant 0 : index
    %21 = vector.load %arg9[%c0_20, %c0_21] : memref<1x2xf32, #tpu.memory_space<vmem>>, vector<1x2xf32>
    %22 = vector.broadcast %21 : vector<1x2xf32> to vector<8x2xf32>
    %23 = arith.addf %20, %22 : vector<8x2xf32>
    %c0_22 = arith.constant 0 : index
    %c0_23 = arith.constant 0 : index
    %24 = vector.load %arg10[%c0_22, %c0_23] : memref<8x2xf32, #tpu.memory_space<vmem>>, vector<8x2xf32>
    tpu.vector_store %arg10[%c0_22, %c0_23], %23 {strides = array<i32>} : memref<8x2xf32, #tpu.memory_space<vmem>>, vector<8x2xf32>,
    return
  }
  func.func @transform_0(%arg0: i32) -> (i32, i32) {
    %c0_i32 = arith.constant 0 : i32
    %c0_i32_0 = arith.constant 0 : i32
    return %arg0, %c0_i32 : i32, i32
  }
  func.func @transform_1(%arg0: i32) -> (i32, i32) {
    %c0_i32 = arith.constant 0 : i32
    %c0_i32_0 = arith.constant 0 : i32
    return %arg0, %c0_i32 : i32, i32
  }
  func.func @transform_2(%arg0: i32) -> (i32, i32) {
    %c0_i32 = arith.constant 0 : i32
    %c0_i32_0 = arith.constant 0 : i32
    %c0_i32_1 = arith.constant 0 : i32
    return %c0_i32, %c0_i32_0 : i32, i32
  }
  func.func @transform_3(%arg0: i32) -> (i32, i32) {
    %c0_i32 = arith.constant 0 : i32
    %c0_i32_0 = arith.constant 0 : i32
    %c0_i32_1 = arith.constant 0 : i32
    return %c0_i32, %c0_i32_0 : i32, i32
  }
  func.func @transform_4(%arg0: i32) -> (i32, i32) {
    %c0_i32 = arith.constant 0 : i32
    %c0_i32_0 = arith.constant 0 : i32
    %c0_i32_1 = arith.constant 0 : i32
    return %c0_i32, %c0_i32_0 : i32, i32
  }
  func.func @transform_5(%arg0: i32) -> (i32, i32) {
    %c0_i32 = arith.constant 0 : i32
    %c0_i32_0 = arith.constant 0 : i32
    %c0_i32_1 = arith.constant 0 : i32
    return %c0_i32, %c0_i32_0 : i32, i32
  }
  func.func @transform_6(%arg0: i32) -> (i32, i32) {
    %c0_i32 = arith.constant 0 : i32
    %c0_i32_0 = arith.constant 0 : i32
    %c0_i32_1 = arith.constant 0 : i32
    return %c0_i32, %c0_i32_0 : i32, i32
  }
  func.func @transform_7(%arg0: i32) -> (i32, i32) {
    %c0_i32 = arith.constant 0 : i32
    %c0_i32_0 = arith.constant 0 : i32
    %c0_i32_1 = arith.constant 0 : i32
    return %c0_i32, %c0_i32_0 : i32, i32
  }
  func.func @transform_8(%arg0: i32) -> (i32, i32) {
    %c0_i32 = arith.constant 0 : i32
    %c0_i32_0 = arith.constant 0 : i32
    %c0_i32_1 = arith.constant 0 : i32
    return %c0_i32, %c0_i32_0 : i32, i32
  }
  func.func @transform_9(%arg0: i32) -> (i32, i32) {
    %c0_i32 = arith.constant 0 : i32
    %c0_i32_0 = arith.constant 0 : i32
    return %arg0, %c0_i32 : i32, i32
  }
}

</mosaic_0001>

<bundles_post_ra>
// kernel: tpu_custom_call.1
= control target key start
LH: loop header
LB: loop body
LE: loop exit
PB: predicated region body
PF: predicated region fallthrough
CT: control target
= control target key end

     0   :  { %vm41_vm0 = vcmask 1043456   ;;  %vm37_vm1 = vcmask 31744   ;;  %v533_v0 = vmov 0.0   ;;  %vm534_vm2 = vmmov 0   ;;  %s703_s3 = inlined_call_operand.vmem [shape: f32[4,128], index: 3, kind: input, shape index: {}]   ;;  %s704_s1 = inlined_call_operand.vmem [shape: f32[8,4], index: 1, kind: input, shape index: {}]   ;;  %s705_s2 = inlined_call_operand.vmem [shape: f32[16,128], index: 2, kind: input, shape index: {}]   ;;  %s706_s5 = inlined_call_operand.vmem [shape: f32[128,64], index: 5, kind: input, shape index: {}]   ;;  %s707_s0 = inlined_call_operand.vmem [shape: f32[8,16], index: 0, kind: input, shape index: {}]   ;;  %s708_s7 = inlined_call_operand.vmem [shape: f32[64,2], index: 7, kind: input, shape index: {}]   ;;  %s709_s4 = inlined_call_operand.vmem [shape: f32[1,128], index: 4, kind: input, shape index: {}]   ;;  %s710_s6 = inlined_call_operand.vmem [shape: f32[1,64], index: 6, kind: input, shape index: {}]   ;;  %s711_s8 = inlined_call_operand.vmem [shape: f32[1,2], index: 8, kind: input, shape index: {}]   ;;  %s712_s9 = inlined_call_operand.vmem [shape: f32[8,2], index: 9, kind: output, shape index: {}]  }
   0x1   :  { %425 = vmatprep.subr.mxu1 %v533_v0  ;;  %v36_v1 = vld [vmem:[%s703_s3] sm:$0xf]  ;;  %427 = vmatprep.mubr.msk.f32.mxu1 %vm534_vm2, %v533_v0  ;;  %v35_v4 = vld [vmem:[%s705_s2 + $0x8] sm:$0xff]  ;;  %v535_v5 = vmov 0.0|0.0   ;;  %v200_v9 = vld [vmem:[%s706_s5 + $0x10] sm:$0xff]  ;;  %vm115_vm3 = vcmask 130048  }
   0x2   :  { %v33_v2 = vld [vmem:[%s704_s1] sm:$0xff]  ;;  %426 = vmatpush3.msk.msra.mxu1 %vm41_vm0, %v36_v1  ;;  %494 = vmatprep.subr.bf16.mxu0 %v535_v5  ;;  %v199_v8 = vld [vmem:[%s706_s5 + $0x8] sm:$0xff]  ;;  %v201_v10 = vld [vmem:[%s706_s5 + $0x18] sm:$0xff]  ;;  %vm307_vm4 = vcmask 523264   ;;  %vm381_vm5 = vcmask 15360  }
   0x3   :  { %v34_v3 = vld [vmem:[%s705_s2] sm:$0xff]  ;;  %428 = vmatmul.mubr.msk.f32.vlgmr.msra.gmra.mrb[0].mxu1 %vm37_vm1, %v33_v2  ;;  %491 = vmatprep.subr.bf16.mxu1 %v535_v5  ;;  %v498_v13 = vpack.c.bf16 %v201_v10, %v200_v9  ;;  %v203_v15 = vld [vmem:[%s706_s5 + $0x28] sm:$0xff]  ;;  %v204_v17 = vld [vmem:[%s706_s5 + $0x30] sm:$0xff] }
   0x4   :  { %v198_v6 = vld [vmem:[%s706_s5] sm:$0xff]  ;;  %v492_v7 = vpack.c.bf16 %v35_v4, %v34_v3  ;;  %434 = vmatprep.mubr.msk.f32.mxu1 %vm534_vm2, %v533_v0  ;;  %469 = vmatprep.mubr.msk.f32.mxu0 %vm534_vm2, %v533_v0  ;;  %v205_v18 = vld [vmem:[%s706_s5 + $0x38] sm:$0xff]  ;;  %v207_v21 = vld [vmem:[%s706_s5 + $0x48] sm:$0xff] }
   0x5   :  { %v495_v11 = vpack.c.bf16 %v199_v8, %v198_v6  ;;  %v32_v12 = vld [vmem:[%s707_s0] sm:$0xff]  ;;  %v504_v19 = vpack.c.bf16 %v205_v18, %v204_v17  ;;  %v208_v23 = vld [vmem:[%s706_s5 + $0x50] sm:$0xff]  ;;  %v209_v24 = vld [vmem:[%s706_s5 + $0x58] sm:$0xff] }
   0x6   :  { %493 = vmatpush3.bf16.msra.mxu1 %v492_v7  ;;  %v202_v14 = vld [vmem:[%s706_s5 + $0x20] sm:$0xff]  ;;  %v510_v25 = vpack.c.bf16 %v209_v24, %v208_v23  ;;  %v211_v27 = vld [vmem:[%s706_s5 + $0x68] sm:$0xff]  ;;  %v212_v29 = vld [vmem:[%s706_s5 + $0x70] sm:$0xff] }
   0x7   :  { %496 = vmatpush3.bf16.msra.mxu0 %v495_v11  ;;  %518 = vmatprep.subr.bf16.mxu1 %v535_v5  ;;  %v501_v16 = vpack.c.bf16 %v203_v15, %v202_v14  ;;  %v206_v20 = vld [vmem:[%s706_s5 + $0x40] sm:$0xff]  ;;  %v213_v30 = vld [vmem:[%s706_s5 + $0x78] sm:$0xff]  ;;  %v293_v33 = vld [vmem:[%s708_s7 + $0x8] sm:$0xff] }
   0x8   :  { %497 = vmatprep.subr.bf16.mxu0 %v535_v5  ;;  %v507_v22 = vpack.c.bf16 %v207_v21, %v206_v20  ;;  %v210_v26 = vld [vmem:[%s706_s5 + $0x60] sm:$0xff]  ;;  %v516_v31 = vpack.c.bf16 %v213_v30, %v212_v29  ;;  %v294_v34 = vld [vmem:[%s708_s7 + $0x10] sm:$0xff]  ;;  %v295_v36 = vld [vmem:[%s708_s7 + $0x18] sm:$0xff] }
   0x9   :  { %435 = vmatmul.mubr.msk.f32.vlgmr.msra.gmra.mrb[2].mxu1 %vm115_vm3, %v32_v12  ;;  %v513_v28 = vpack.c.bf16 %v211_v27, %v210_v26  ;;  %v292_v32 = vld [vmem:[%s708_s7] sm:$0xff]  ;;  %v522_v37 = vpack.c.bf16 %v295_v36, %v294_v34  ;;  %v297_v39 = vld [vmem:[%s708_s7 + $0x28] sm:$0xff]  ;;  %v298_v49 = vld [vmem:[%s708_s7 + $0x30] sm:$0xff] }
   0xa   :  { %488 = vmatprep.mubr.msk.f32.mxu1 %vm534_vm2, %v533_v0  ;;  %v519_v35 = vpack.c.bf16 %v293_v33, %v292_v32  ;;  %v296_v38 = vld [vmem:[%s708_s7 + $0x20] sm:$0xff]  ;;  %v299_v50 = vld [vmem:[%s708_s7 + $0x38] sm:$0xff] }
   0xb   :  { %499 = vmatpush3.bf16.msra.mxu0 %v498_v13  ;;  %v525_v40 = vpack.c.bf16 %v297_v39, %v296_v38  ;;  %v390_v44 = vld [vmem:[%s709_s4] ss:$0 sm:$0xff]  ;;  %v528_v51 = vpack.c.bf16 %v299_v50, %v298_v49 }
   0xc   :  { %500 = vmatprep.subr.bf16.mxu0 %v535_v5  ;;  %520 = vmatpush3.bf16.msra.mxu1 %v519_v35  ;;  %v391_v52 = vld [vmem:[%s710_s6] ss:$0 sm:$0xff] }
   0xd   :  { %521 = vmatprep.subr.bf16.mxu1 %v535_v5  ;;  %v392_v57 = vld [vmem:[%s711_s8] ss:$0 sm:$0xff] }
   0xf   :  { %502 = vmatpush3.bf16.msra.mxu0 %v501_v16 }
  0x10   :  { %503 = vmatprep.subr.bf16.mxu0 %v535_v5  ;;  %523 = vmatpush3.bf16.msra.mxu1 %v522_v37 }
  0x11   :  { %524 = vmatprep.subr.bf16.mxu1 %v535_v5 }
  0x13   :  { %505 = vmatpush3.bf16.msra.mxu0 %v504_v19 }
  0x14   :  { %506 = vmatprep.subr.bf16.mxu0 %v535_v5  ;;  %526 = vmatpush3.bf16.msra.mxu1 %v525_v40 }
  0x15   :  { %527 = vmatprep.subr.bf16.mxu1 %v535_v5 }
  0x17   :  { %508 = vmatpush3.bf16.msra.mxu0 %v507_v22 }
  0x18   :  { %509 = vmatprep.subr.bf16.mxu0 %v535_v5  ;;  %529 = vmatpush3.bf16.msra.mxu1 %v528_v51 }
  0x1b   :  { %511 = vmatpush3.bf16.msra.mxu0 %v510_v25 }
  0x1c   :  { %512 = vmatprep.subr.bf16.mxu0 %v535_v5 }
  0x1f   :  { %514 = vmatpush3.bf16.msra.mxu0 %v513_v28 }
  0x20   :  { %515 = vmatprep.subr.bf16.mxu0 %v535_v5 }
  0x23   :  { %517 = vmatpush3.bf16.msra.mxu0 %v516_v31 }
  0xd6   :  { %v111_v41 = vpop.f32.mrb[0].mxu1 }
  0xd7   :  { %v429_v42 = vpop.f32.mrb[1].mxu1 }
  0xdc   :  { %v185_v43 = vpop.f32.mrb[2].mxu1 }
  0xdd   :  { %v186_v45 = vadd.f32 %v185_v43, %v111_v41  ;;  %v436_v46 = vpop.f32.mrb[3].mxu1 }
  0xdf   :  { %v196_v47 = vadd.f32 %v390_v44, %v186_v45 }
  0xe1   :  { %v197_v48 = vmax.f32 %v196_v47, 0.0 }
  0xe3   :  { %470 = vmatmul.mubr.f32.vlgmr.msra.gmra.mrb[0].mxu0 %v197_v48 }
 0x1b6   :  { %v287_v53 = vpop.f32.mrb[0].mxu0 }
 0x1b7   :  { %v288_v54 = vadd.f32 %v391_v52, %v287_v53  ;;  %v471_v55 = vpop.f32.mrb[1].mxu0 }
 0x1b9   :  { %v291_v56 = vmax.f32 %v288_v54, 0.0 }
 0x1bb   :  { %489 = vmatmul.mubr.msk.f32.vlgmr.msra.gmra.mrb[4].mxu1 %vm307_vm4, %v291_v56 }
 0x28e   :  { %v377_v58 = vpop.f32.mrb[4].mxu1 }
 0x28f   :  { %v378_v59 = vadd.f32 %v392_v57, %v377_v58  ;;  %v490_v60 = vpop.f32.mrb[5].mxu1 }
 0x291   :  { %382 = vst.msk [vmem:[%s712_s9] sm:$0xff] %vm381_vm5, %v378_v59 }

</bundles_post_ra>
